<compile_context>
chip_gen: v7x
topology: tpu7x:2x2x1
jax: 0.10.0
libtpu: 0.0.40
codegen_flags: <defaults>
</compile_context>

<pallas_src>
import jax
import jax.numpy as jnp
from jax.experimental import pallas as pl
from jax.experimental.pallas import tpu as pltpu


def _project_kernel(x_ref, comp_t_ref, out_ref):
    # x_ref:      [TM, N]  tile of the neural data (streamed once over T)
    # comp_t_ref: [N, KP]  components.T zero-padded to 128 lanes (resident)
    # out_ref:    [TM, KP] lane-dense f32 output tile
    out_ref[...] = jnp.dot(
        x_ref[...], comp_t_ref[...], preferred_element_type=jnp.float32
    )


def pca_encode(x, pca_mean, components, *, tm=None, vmem_budget_bytes=32 * 1024 * 1024):
    """
    x:          [T, N]  neural data (time x neurons), f32 or bf16
    pca_mean:   [N]     PCA fitted mean_
    components: [K, N]  PCA components_
    returns:    [T, K]  latents (f32)
    """
    T, N = x.shape
    K = components.shape[0]

    # Stream x in its native precision (bf16 halves the dominant HBM read stream).
    compute_dtype = jnp.bfloat16 if x.dtype == jnp.bfloat16 else jnp.float32
    x = x.astype(compute_dtype)
    x_bytes = jnp.dtype(compute_dtype).itemsize

    # Pad K to full 128-lane tiles so output stores are lane-dense / unmasked.
    KP = ((K + 127) // 128) * 128
    comp_t = (
        jnp.zeros((N, KP), compute_dtype)
        .at[:, :K]
        .set(components.astype(compute_dtype).T)
    )

    # --- derive the T tile from a VMEM budget (double-buffered x + out, resident C) --
    resident_bytes = 2 * N * KP * x_bytes            # comp_t (worst case double-buffered)
    per_row_bytes = 2 * (N * x_bytes + KP * 4)       # double-buffered x tile + f32 out tile
    if tm is None:
        avail = max(vmem_budget_bytes - resident_bytes, per_row_bytes * 256)
        tm = min(4096, max(256, (avail // per_row_bytes) // 256 * 256))
    if T <= tm:
        TM = T                          # single tile; block == full dim is always legal
    else:
        TM = max(8, (tm // 8) * 8)      # keep sublane (8) alignment for partial tiles
    n_tiles = pl.cdiv(T, TM)            # ragged last tile handled by Pallas (no jnp.pad)

    vmem_needed = 2 * TM * N * x_bytes + 2 * TM * KP * 4 + resident_bytes
    vmem_limit = int(min(max(vmem_needed + (4 << 20), 16 << 20), 48 << 20))

    cost = pl.CostEstimate(
        flops=2 * T * N * KP,
        transcendentals=0,
        bytes_accessed=T * N * x_bytes + N * KP * x_bytes + T * KP * 4,
    )

    raw = pl.pallas_call(
        _project_kernel,
        out_shape=jax.ShapeDtypeStruct((T, KP), jnp.float32),
        grid_spec=pl.GridSpec(
            grid=(n_tiles,),
            in_specs=[
                pl.BlockSpec((TM, N), lambda i: (i, 0)),   # x tile (streamed once)
                pl.BlockSpec((N, KP), lambda i: (0, 0)),   # components.T (resident)
            ],
            out_specs=pl.BlockSpec((TM, KP), lambda i: (i, 0)),
        ),
        compiler_params=pltpu.CompilerParams(
            dimension_semantics=("parallel",),
            vmem_limit_bytes=vmem_limit,
        ),
        cost_estimate=cost,
    )(x, comp_t)

    # Both mean corrections derived from the raw projection (no second pass over x):
    #   (x - mean_t(x) - pca_mean) @ C == (x @ C) - mean_rows(x @ C) - pca_mean @ C
    pca_corr = pca_mean.astype(jnp.float32)[None, :] @ comp_t.astype(jnp.float32)  # [1,KP]
    corr = jnp.mean(raw, axis=0, keepdims=True) + pca_corr                          # [1,KP]
    latents = raw[:, :K] - corr[:, :K]   # fused subtract + slice in XLA
    return latents


if __name__ == "__main__":
    key = jax.random.PRNGKey(0)
    k_x, k_c, k_m = jax.random.split(key, 3)

    # Small shapes consistent with the module: a trial's neural df is [T, N].
    T, N = 200, 128          # time steps x neurons (T chosen so the small tile is ragged)
    K = 16                   # num_components

    x = jax.random.normal(k_x, (T, N), dtype=jnp.float32)

    # Deterministic synthetic PCA parameters: orthonormal components (K, N),
    # mean_ ~ 0 (PCA was fit on already-centered data in on_train_start).
    rand = jax.random.normal(k_c, (N, N), dtype=jnp.float32)
    q, _ = jnp.linalg.qr(rand)
    components = q[:K, :]                          # [K, N], rows orthonormal
    pca_mean = 1e-3 * jax.random.normal(k_m, (N,), dtype=jnp.float32)

    # Reference in plain JAX (same math as the PyTorch forward).
    ref = (x - jnp.mean(x, axis=0, keepdims=True) - pca_mean[None, :]) @ components.T

    # Default path: single tile (T <= derived TM).
    lat_default = pca_encode(x, pca_mean, components)
    # Forced small tile: multi-tile parallel grid with a ragged last tile (200 = 3*64 + 8).
    lat_tiled = pca_encode(x, pca_mean, components, tm=64)
    jax.block_until_ready((lat_default, lat_tiled))

    assert lat_default.shape == (T, K)
    assert lat_tiled.shape == (T, K)
    assert jnp.allclose(lat_default, ref, atol=1e-4, rtol=1e-4)
    assert jnp.allclose(lat_tiled, ref, atol=1e-4, rtol=1e-4)

    # TODO(synk): sklearn PCA fitting / LinearRegression in on_train_start are training-time
    # setup, not part of the forward pass, and are not translated.  The stray `exit()` in
    # forward is ignored.
    print("KERNEL_OK")
</pallas_src>

<mosaic_0001>
module attributes {stable_mosaic.version = 11 : i64} {
  func.func @_project_kernel(%arg0: i32, %arg1: memref<200x128xf32, #tpu.memory_space<vmem>>, %arg2: memref<128x128xf32, #tpu.memory_space<vmem>>, %arg3: memref<200x128xf32, #tpu.memory_space<vmem>>) attributes {dimension_semantics = [#tpu.dimension_semantics<parallel>], iteration_bounds = array<i64: 1>, scalar_prefetch = 0 : i64, scratch_operands = 0 : i64, tpu.core_type = #tpu.core_type<tc>, window_params = [{transform_indices = @transform_0, window_bounds = array<i64: 200, 128>}, {pipeline_mode = #tpu.pipeline_mode<synchronous>, transform_indices = @transform_1, window_bounds = array<i64: 128, 128>}, {transform_indices = @transform_2, window_bounds = array<i64: 200, 128>}]} {
    %c0 = arith.constant 0 : index
    %c0_0 = arith.constant 0 : index
    %0 = vector.load %arg1[%c0, %c0_0] : memref<200x128xf32, #tpu.memory_space<vmem>>, vector<200x128xf32>
    %c0_1 = arith.constant 0 : index
    %c0_2 = arith.constant 0 : index
    %1 = vector.load %arg2[%c0_1, %c0_2] : memref<128x128xf32, #tpu.memory_space<vmem>>, vector<128x128xf32>
    %cst = arith.constant dense<0.000000e+00> : vector<200x128xf32>
    %2 = tpu.matmul %0, %1, %cst {dimension_numbers = #tpu.dot_dimension_numbers<[1], [0], [0], [1], [0, 0, 1, 1], [], []>} : vector<200x128xf32>, vector<128x128xf32>, vector<200x128xf32> -> vector<200x128xf32>
    %c0_3 = arith.constant 0 : index
    %c0_4 = arith.constant 0 : index
    %3 = vector.load %arg3[%c0_3, %c0_4] : memref<200x128xf32, #tpu.memory_space<vmem>>, vector<200x128xf32>
    tpu.vector_store %arg3[%c0_3, %c0_4], %2 {strides = array<i32>} : memref<200x128xf32, #tpu.memory_space<vmem>>, vector<200x128xf32>,
    return
  }
  func.func @transform_0(%arg0: i32) -> (i32, i32) {
    %c0_i32 = arith.constant 0 : i32
    %c0_i32_0 = arith.constant 0 : i32
    return %arg0, %c0_i32 : i32, i32
  }
  func.func @transform_1(%arg0: i32) -> (i32, i32) {
    %c0_i32 = arith.constant 0 : i32
    %c0_i32_0 = arith.constant 0 : i32
    %c0_i32_1 = arith.constant 0 : i32
    return %c0_i32, %c0_i32_0 : i32, i32
  }
  func.func @transform_2(%arg0: i32) -> (i32, i32) {
    %c0_i32 = arith.constant 0 : i32
    %c0_i32_0 = arith.constant 0 : i32
    return %arg0, %c0_i32 : i32, i32
  }
}

</mosaic_0001>

<bundles_post_ra>
// kernel: tpu_custom_call.1
= control target key start
LH: loop header
LB: loop body
LE: loop exit
PB: predicated region body
PF: predicated region fallthrough
CT: control target
= control target key end

     0   :  { %7 = vsyncpa [#allocation3], 0  ;;  %s700_s0 = inlined_call_operand.hbm [shape: f32[200,128], index: 0, kind: input, shape index: {}]   ;;  %s701_s1 = inlined_call_operand.hbm [shape: f32[128,128], index: 1, kind: input, shape index: {}]   ;;  %s702_s2 = inlined_call_operand.hbm [shape: f32[200,128], index: 2, kind: output, shape index: {}]  }
   0x1   :  { %8 = vsyncpa [#allocation6], 0 }
   0x2   :  { %9 = vsyncpa [#allocation4], 0  ;;  %s582_s9 = smov [#allocation2]   ;;  %s510_s13 = scalar_lea.hbm %s700_s0, 3200 }
   0x3   :  { %s15_s10 = sshll.u32 %s582_s9, 4  ;;  %p511_p0 = scmp.ne.s32.totalorder %s700_s0, %s510_s13  ;;  %s16_s10 = int_to_ptr.vmem [resolvable:$true] %s15_s10 }
   0x4   :  { %p514_p1 = scmp.lt.u32.totalorder %s510_s13, %s700_s0 }
   0x6   :  { %p516_p2 = pnand %p514_p1, %p511_p0 }
   0x8   :  { %519 = shalt.err (!%p516_p2)
}
   0x9   :  { %s520_s18 = scalar_lea.vmem %s16_s10, 3200  ;;  %p525_p4 = scmp.lt.s32.totalorder %s16_s10, %s16_s10 }
   0xa   :  { %p521_p3 = scmp.ne.s32.totalorder %s16_s10, %s520_s18  ;;  %p526_p5 = scmp.lt.s32.totalorder %s520_s18, %s520_s18 }
   0xc   :  { %p527_p6 = por %p526_p5, %p525_p4 }
   0xe   :  { %p528_p7 = pnand %p527_p6, %p521_p3 }
  0x10   :  { %531 = shalt.err (!%p528_p7)
}
  0x11   :  { %s583_s19 = smov 128   ;;  %s584_s20 = smov 8  }
  0x12   :  { %21 = dma.hbm_to_vmem [thread:$0]  %s700_s0, 3200, %s16_s10, [#allocation3], %s583_s19, %s583_s19, %s584_s20  }
  0x13   :  { %s585_s23 = smov [#allocation5]   ;;  %s532_s27 = scalar_lea.hbm %s701_s1, 2048 }
  0x14   :  { %s27_s24 = sshll.u32 %s585_s23, 4  ;;  %p533_p8 = scmp.ne.s32.totalorder %s701_s1, %s532_s27  ;;  %s28_s24 = int_to_ptr.vmem [resolvable:$true] %s27_s24 }
  0x15   :  { %p536_p9 = scmp.lt.u32.totalorder %s532_s27, %s701_s1 }
  0x17   :  { %p538_p10 = pnand %p536_p9, %p533_p8 }
  0x19   :  { %541 = shalt.err (!%p538_p10)
}
  0x1a   :  { %s542_s4 = scalar_lea.vmem %s28_s24, 2048  ;;  %p547_p12 = scmp.lt.s32.totalorder %s28_s24, %s28_s24 }
  0x1b   :  { %p543_p11 = scmp.ne.s32.totalorder %s28_s24, %s542_s4  ;;  %p548_p13 = scmp.lt.s32.totalorder %s542_s4, %s542_s4 }
  0x1d   :  { %p549_p0 = por %p548_p13, %p547_p12 }
  0x1f   :  { %p550_p1 = pnand %p549_p0, %p543_p11 }
  0x21   :  { %553 = shalt.err (!%p550_p1)
}
  0x22   :  { %33 = dma.hbm_to_vmem [thread:$0]  %s701_s1, 2048, %s28_s24, [#allocation6], %s583_s19, %s583_s19, %s584_s20  }
  0x23   :  { %576 = dma.done.wait [#allocation3], 3200  }
  0x24   :  { %577 = vsyncadd [#allocation3], 4294964096 }
  0x25   :  { %578 = dma.done.wait [#allocation6], 2048  }
  0x26   :  { %579 = vsyncadd [#allocation6], 4294965248  ;;  %v586_v0 = vmov 0.0|0.0   ;;  %vm587_vm0 = vmmov 0   ;;  %v588_v1 = vmov 0.0   ;;  %v65_v2 = vld [vmem:[#allocation5] sm:$0xff] }
  0x27   :  { %462 = vmatprep.subr.bf16.mxu0 %v586_v0  ;;  %486 = vmatprep.subr.bf16.mxu1 %v586_v0  ;;  %v66_v3 = vld [vmem:[#allocation5 + $0x8] sm:$0xff]  ;;  %v67_v4 = vld [vmem:[#allocation5 + $0x10] sm:$0xff]  ;;  %v68_v6 = vld [vmem:[#allocation5 + $0x18] sm:$0xff]  ;;  %s589_s1 = smov [#allocation7]  }
  0x28   :  { %387 = vmatprep.mubr.msk.f32.mxu0 %vm587_vm0, %v588_v1  ;;  %426 = vmatprep.mubr.msk.f32.mxu1 %vm587_vm0, %v588_v1  ;;  %v463_v5 = vpack.c.bf16 %v66_v3, %v65_v2  ;;  %v466_v7 = vpack.c.bf16 %v68_v6, %v67_v4  ;;  %v69_v8 = vld [vmem:[#allocation5 + $0x20] sm:$0xff]  ;;  %v70_v9 = vld [vmem:[#allocation5 + $0x28] sm:$0xff]  ;;  %v71_v11 = vld [vmem:[#allocation5 + $0x30] sm:$0xff]  ;;  %s301_s6 = sshll.u32 %s589_s1, 4  ;;  %s302_s6 = int_to_ptr.vmem [resolvable:$true] %s301_s6 }
  0x29   :  { %v469_v10 = vpack.c.bf16 %v70_v9, %v69_v8  ;;  %v72_v12 = vld [vmem:[#allocation5 + $0x38] sm:$0xff]  ;;  %v73_v14 = vld [vmem:[#allocation5 + $0x40] sm:$0xff]  ;;  %v74_v15 = vld [vmem:[#allocation5 + $0x48] sm:$0xff]  ;;  %s554_s7 = scalar_lea.vmem %s302_s6, 3200  ;;  %p559_p3 = scmp.lt.s32.totalorder %s302_s6, %s302_s6 }
  0x2a   :  { %464 = vmatpush3.bf16.msra.mxu0 %v463_v5  ;;  %494 = vmatpush3.bf16.msra.mxu1 %v463_v5  ;;  %v472_v13 = vpack.c.bf16 %v72_v12, %v71_v11  ;;  %v475_v16 = vpack.c.bf16 %v74_v15, %v73_v14  ;;  %v75_v17 = vld [vmem:[#allocation5 + $0x50] sm:$0xff]  ;;  %v76_v18 = vld [vmem:[#allocation5 + $0x58] sm:$0xff]  ;;  %v77_v20 = vld [vmem:[#allocation5 + $0x60] sm:$0xff]  ;;  %p555_p2 = scmp.ne.s32.totalorder %s302_s6, %s554_s7  ;;  %p560_p4 = scmp.lt.s32.totalorder %s554_s7, %s554_s7 }
  0x2b   :  { %465 = vmatprep.subr.bf16.mxu0 %v586_v0  ;;  %487 = vmatprep.subr.bf16.mxu1 %v586_v0  ;;  %v478_v19 = vpack.c.bf16 %v76_v18, %v75_v17  ;;  %v78_v21 = vld [vmem:[#allocation5 + $0x68] sm:$0xff]  ;;  %v79_v23 = vld [vmem:[#allocation5 + $0x70] sm:$0xff]  ;;  %v80_v24 = vld [vmem:[#allocation5 + $0x78] sm:$0xff] }
  0x2c   :  { %v481_v22 = vpack.c.bf16 %v78_v21, %v77_v20  ;;  %v484_v25 = vpack.c.bf16 %v80_v24, %v79_v23  ;;  %v40_v26 = vld [vmem:[#allocation2] sm:$0xff]  ;;  %v53_v27 = vld [vmem:[#allocation2 + $0x68] sm:$0xff]  ;;  %v54_v29 = vld [vmem:[#allocation2 + $0x70] sm:$0xff]  ;;  %p561_p5 = por %p560_p4, %p559_p3 }
  0x2d   :  { %v41_v28 = vld [vmem:[#allocation2 + $0x8] sm:$0xff]  ;;  %v42_v30 = vld [vmem:[#allocation2 + $0x10] sm:$0xff]  ;;  %v55_v31 = vld [vmem:[#allocation2 + $0x78] sm:$0xff] }
  0x2e   :  { %467 = vmatpush3.bf16.msra.mxu0 %v466_v7  ;;  %495 = vmatpush3.bf16.msra.mxu1 %v466_v7  ;;  %v43_v32 = vld [vmem:[#allocation2 + $0x18] sm:$0xff]  ;;  %v56_v33 = vld [vmem:[#allocation2 + $0x80] sm:$0xff]  ;;  %v57_v35 = vld [vmem:[#allocation2 + $0x88] sm:$0xff]  ;;  %p562_p6 = pnand %p561_p5, %p555_p2 }
  0x2f   :  { %468 = vmatprep.subr.bf16.mxu0 %v586_v0  ;;  %488 = vmatprep.subr.bf16.mxu1 %v586_v0  ;;  %v44_v34 = vld [vmem:[#allocation2 + $0x20] sm:$0xff]  ;;  %v45_v36 = vld [vmem:[#allocation2 + $0x28] sm:$0xff]  ;;  %v58_v37 = vld [vmem:[#allocation2 + $0x90] sm:$0xff] }
  0x30   :  { %v46_v38 = vld [vmem:[#allocation2 + $0x30] sm:$0xff]  ;;  %v59_v39 = vld [vmem:[#allocation2 + $0x98] sm:$0xff]  ;;  %v60_v41 = vld [vmem:[#allocation2 + $0xa0] sm:$0xff] }
  0x31   :  { %v47_v40 = vld [vmem:[#allocation2 + $0x38] sm:$0xff]  ;;  %v48_v42 = vld [vmem:[#allocation2 + $0x40] sm:$0xff]  ;;  %v61_v43 = vld [vmem:[#allocation2 + $0xa8] sm:$0xff] }
  0x32   :  { %470 = vmatpush3.bf16.msra.mxu0 %v469_v10  ;;  %496 = vmatpush3.bf16.msra.mxu1 %v469_v10  ;;  %v49_v44 = vld [vmem:[#allocation2 + $0x48] sm:$0xff]  ;;  %v62_v45 = vld [vmem:[#allocation2 + $0xb0] sm:$0xff]  ;;  %v63_v47 = vld [vmem:[#allocation2 + $0xb8] sm:$0xff] }
  0x33   :  { %471 = vmatprep.subr.bf16.mxu0 %v586_v0  ;;  %489 = vmatprep.subr.bf16.mxu1 %v586_v0  ;;  %v50_v46 = vld [vmem:[#allocation2 + $0x50] sm:$0xff]  ;;  %v51_v48 = vld [vmem:[#allocation2 + $0x58] sm:$0xff]  ;;  %v64_v49 = vld [vmem:[#allocation2 + $0xc0] sm:$0xff] }
  0x34   :  { %v52_v50 = vld [vmem:[#allocation2 + $0x60] sm:$0xff] }
  0x36   :  { %473 = vmatpush3.bf16.msra.mxu0 %v472_v13  ;;  %497 = vmatpush3.bf16.msra.mxu1 %v472_v13 }
  0x37   :  { %474 = vmatprep.subr.bf16.mxu0 %v586_v0  ;;  %490 = vmatprep.subr.bf16.mxu1 %v586_v0 }
  0x3a   :  { %476 = vmatpush3.bf16.msra.mxu0 %v475_v16  ;;  %498 = vmatpush3.bf16.msra.mxu1 %v475_v16 }
  0x3b   :  { %477 = vmatprep.subr.bf16.mxu0 %v586_v0  ;;  %491 = vmatprep.subr.bf16.mxu1 %v586_v0 }
  0x3e   :  { %479 = vmatpush3.bf16.msra.mxu0 %v478_v19  ;;  %499 = vmatpush3.bf16.msra.mxu1 %v478_v19 }
  0x3f   :  { %480 = vmatprep.subr.bf16.mxu0 %v586_v0  ;;  %492 = vmatprep.subr.bf16.mxu1 %v586_v0 }
  0x42   :  { %482 = vmatpush3.bf16.msra.mxu0 %v481_v22  ;;  %500 = vmatpush3.bf16.msra.mxu1 %v481_v22 }
  0x43   :  { %483 = vmatprep.subr.bf16.mxu0 %v586_v0  ;;  %493 = vmatprep.subr.bf16.mxu1 %v586_v0 }
  0x46   :  { %485 = vmatpush3.bf16.msra.mxu0 %v484_v25  ;;  %501 = vmatpush3.bf16.msra.mxu1 %v484_v25 }
  0x49   :  { %388 = vmatmul.mubr.f32.vlgmr.msra.gmra.mrb[0].mxu0 %v40_v26  ;;  %427 = vmatmul.mubr.f32.vlgmr.msra.gmra.mrb[0].mxu1 %v53_v27 }
  0x4a   :  { %390 = vmatprep.mubr.msk.f32.mxu0 %vm587_vm0, %v588_v1  ;;  %429 = vmatprep.mubr.msk.f32.mxu1 %vm587_vm0, %v588_v1 }
  0x4d   :  { %391 = vmatmul.mubr.f32.gmra.mrb[2].mxu0 %v41_v28  ;;  %430 = vmatmul.mubr.f32.gmra.mrb[2].mxu1 %v54_v29 }
  0x4e   :  { %393 = vmatprep.mubr.msk.f32.mxu0 %vm587_vm0, %v588_v1  ;;  %432 = vmatprep.mubr.msk.f32.mxu1 %vm587_vm0, %v588_v1 }
  0x51   :  { %394 = vmatmul.mubr.f32.gmra.mrb[4].mxu0 %v42_v30  ;;  %433 = vmatmul.mubr.f32.gmra.mrb[4].mxu1 %v55_v31 }
  0x52   :  { %396 = vmatprep.mubr.msk.f32.mxu0 %vm587_vm0, %v588_v1  ;;  %435 = vmatprep.mubr.msk.f32.mxu1 %vm587_vm0, %v588_v1 }
  0x55   :  { %397 = vmatmul.mubr.f32.gmra.mrb[6].mxu0 %v43_v32  ;;  %436 = vmatmul.mubr.f32.gmra.mrb[6].mxu1 %v56_v33 }
  0x56   :  { %399 = vmatprep.mubr.msk.f32.mxu0 %vm587_vm0, %v588_v1  ;;  %438 = vmatprep.mubr.msk.f32.mxu1 %vm587_vm0, %v588_v1 }
  0x59   :  { %400 = vmatmul.mubr.f32.gmra.mrb[8].mxu0 %v44_v34  ;;  %439 = vmatmul.mubr.f32.gmra.mrb[8].mxu1 %v57_v35 }
  0x5a   :  { %402 = vmatprep.mubr.msk.f32.mxu0 %vm587_vm0, %v588_v1  ;;  %441 = vmatprep.mubr.msk.f32.mxu1 %vm587_vm0, %v588_v1 }
  0x5d   :  { %403 = vmatmul.mubr.f32.gmra.mrb[10].mxu0 %v45_v36  ;;  %442 = vmatmul.mubr.f32.gmra.mrb[10].mxu1 %v58_v37 }
  0x5e   :  { %405 = vmatprep.mubr.msk.f32.mxu0 %vm587_vm0, %v588_v1  ;;  %444 = vmatprep.mubr.msk.f32.mxu1 %vm587_vm0, %v588_v1 }
  0x61   :  { %406 = vmatmul.mubr.f32.gmra.mrb[12].mxu0 %v46_v38  ;;  %445 = vmatmul.mubr.f32.gmra.mrb[12].mxu1 %v59_v39 }
  0x62   :  { %408 = vmatprep.mubr.msk.f32.mxu0 %vm587_vm0, %v588_v1  ;;  %447 = vmatprep.mubr.msk.f32.mxu1 %vm587_vm0, %v588_v1 }
  0x65   :  { %409 = vmatmul.mubr.f32.gmra.mrb[14].mxu0 %v47_v40  ;;  %448 = vmatmul.mubr.f32.gmra.mrb[14].mxu1 %v60_v41 }
  0x66   :  { %411 = vmatprep.mubr.msk.f32.mxu0 %vm587_vm0, %v588_v1  ;;  %450 = vmatprep.mubr.msk.f32.mxu1 %vm587_vm0, %v588_v1 }
  0x69   :  { %412 = vmatmul.mubr.f32.gmra.mrb[16].mxu0 %v48_v42  ;;  %451 = vmatmul.mubr.f32.gmra.mrb[16].mxu1 %v61_v43 }
  0x6a   :  { %414 = vmatprep.mubr.msk.f32.mxu0 %vm587_vm0, %v588_v1  ;;  %453 = vmatprep.mubr.msk.f32.mxu1 %vm587_vm0, %v588_v1 }
  0x6d   :  { %415 = vmatmul.mubr.f32.gmra.mrb[18].mxu0 %v49_v44  ;;  %454 = vmatmul.mubr.f32.gmra.mrb[18].mxu1 %v62_v45 }
  0x6e   :  { %417 = vmatprep.mubr.msk.f32.mxu0 %vm587_vm0, %v588_v1  ;;  %456 = vmatprep.mubr.msk.f32.mxu1 %vm587_vm0, %v588_v1 }
  0x71   :  { %418 = vmatmul.mubr.f32.gmra.mrb[20].mxu0 %v50_v46  ;;  %457 = vmatmul.mubr.f32.gmra.mrb[20].mxu1 %v63_v47 }
  0x72   :  { %420 = vmatprep.mubr.msk.f32.mxu0 %vm587_vm0, %v588_v1  ;;  %459 = vmatprep.mubr.msk.f32.mxu1 %vm587_vm0, %v588_v1 }
  0x75   :  { %421 = vmatmul.mubr.f32.gmra.mrb[22].mxu0 %v51_v48  ;;  %460 = vmatmul.mubr.f32.gmra.mrb[22].mxu1 %v64_v49 }
  0x76   :  { %423 = vmatprep.mubr.msk.f32.mxu0 %vm587_vm0, %v588_v1 }
  0x79   :  { %424 = vmatmul.mubr.f32.gmra.mrb[24].mxu0 %v52_v50 }
 0x11c   :  { %v147_v51 = vpop.f32.mrb[0].mxu0  ;;  %v212_v52 = vpop.f32.mrb[0].mxu1 }
 0x11d   :  { %271 = vst [vmem:[#allocation7] sm:$0xff] %v147_v51  ;;  %v389_v53 = vpop.f32.mrb[1].mxu0  ;;  %284 = vst [vmem:[#allocation7 + $0x68] sm:$0xff] %v212_v52  ;;  %v428_v54 = vpop.f32.mrb[1].mxu1 }
 0x120   :  { %v152_v55 = vpop.f32.mrb[2].mxu0  ;;  %v217_v56 = vpop.f32.mrb[2].mxu1 }
 0x121   :  { %272 = vst [vmem:[#allocation7 + $0x8] sm:$0xff] %v152_v55  ;;  %v392_v57 = vpop.f32.mrb[3].mxu0  ;;  %285 = vst [vmem:[#allocation7 + $0x70] sm:$0xff] %v217_v56  ;;  %v431_v58 = vpop.f32.mrb[3].mxu1 }
 0x124   :  { %v157_v59 = vpop.f32.mrb[4].mxu0  ;;  %v222_v60 = vpop.f32.mrb[4].mxu1 }
 0x125   :  { %273 = vst [vmem:[#allocation7 + $0x10] sm:$0xff] %v157_v59  ;;  %v395_v61 = vpop.f32.mrb[5].mxu0  ;;  %286 = vst [vmem:[#allocation7 + $0x78] sm:$0xff] %v222_v60  ;;  %v434_v62 = vpop.f32.mrb[5].mxu1 }
 0x128   :  { %v162_v63 = vpop.f32.mrb[6].mxu0  ;;  %v227_v0 = vpop.f32.mrb[6].mxu1 }
 0x129   :  { %274 = vst [vmem:[#allocation7 + $0x18] sm:$0xff] %v162_v63  ;;  %v398_v1 = vpop.f32.mrb[7].mxu0  ;;  %287 = vst [vmem:[#allocation7 + $0x80] sm:$0xff] %v227_v0  ;;  %v437_v2 = vpop.f32.mrb[7].mxu1 }
 0x12c   :  { %v167_v3 = vpop.f32.mrb[8].mxu0  ;;  %v232_v4 = vpop.f32.mrb[8].mxu1 }
 0x12d   :  { %275 = vst [vmem:[#allocation7 + $0x20] sm:$0xff] %v167_v3  ;;  %v401_v5 = vpop.f32.mrb[9].mxu0  ;;  %288 = vst [vmem:[#allocation7 + $0x88] sm:$0xff] %v232_v4  ;;  %v440_v6 = vpop.f32.mrb[9].mxu1 }
 0x130   :  { %v172_v7 = vpop.f32.mrb[10].mxu0  ;;  %v237_v8 = vpop.f32.mrb[10].mxu1 }
 0x131   :  { %276 = vst [vmem:[#allocation7 + $0x28] sm:$0xff] %v172_v7  ;;  %v404_v9 = vpop.f32.mrb[11].mxu0  ;;  %289 = vst [vmem:[#allocation7 + $0x90] sm:$0xff] %v237_v8  ;;  %v443_v10 = vpop.f32.mrb[11].mxu1 }
 0x134   :  { %v177_v11 = vpop.f32.mrb[12].mxu0  ;;  %v242_v12 = vpop.f32.mrb[12].mxu1 }
 0x135   :  { %277 = vst [vmem:[#allocation7 + $0x30] sm:$0xff] %v177_v11  ;;  %v407_v13 = vpop.f32.mrb[13].mxu0  ;;  %290 = vst [vmem:[#allocation7 + $0x98] sm:$0xff] %v242_v12  ;;  %v446_v14 = vpop.f32.mrb[13].mxu1 }
 0x138   :  { %v182_v15 = vpop.f32.mrb[14].mxu0  ;;  %v247_v16 = vpop.f32.mrb[14].mxu1 }
 0x139   :  { %278 = vst [vmem:[#allocation7 + $0x38] sm:$0xff] %v182_v15  ;;  %v410_v17 = vpop.f32.mrb[15].mxu0  ;;  %291 = vst [vmem:[#allocation7 + $0xa0] sm:$0xff] %v247_v16  ;;  %v449_v18 = vpop.f32.mrb[15].mxu1 }
 0x13c   :  { %v187_v19 = vpop.f32.mrb[16].mxu0  ;;  %v252_v20 = vpop.f32.mrb[16].mxu1 }
 0x13d   :  { %279 = vst [vmem:[#allocation7 + $0x40] sm:$0xff] %v187_v19  ;;  %v413_v21 = vpop.f32.mrb[17].mxu0  ;;  %292 = vst [vmem:[#allocation7 + $0xa8] sm:$0xff] %v252_v20  ;;  %v452_v22 = vpop.f32.mrb[17].mxu1 }
 0x140   :  { %v192_v23 = vpop.f32.mrb[18].mxu0  ;;  %v257_v24 = vpop.f32.mrb[18].mxu1 }
 0x141   :  { %280 = vst [vmem:[#allocation7 + $0x48] sm:$0xff] %v192_v23  ;;  %v416_v25 = vpop.f32.mrb[19].mxu0  ;;  %293 = vst [vmem:[#allocation7 + $0xb0] sm:$0xff] %v257_v24  ;;  %v455_v26 = vpop.f32.mrb[19].mxu1 }
 0x144   :  { %v197_v27 = vpop.f32.mrb[20].mxu0  ;;  %v262_v28 = vpop.f32.mrb[20].mxu1 }
 0x145   :  { %281 = vst [vmem:[#allocation7 + $0x50] sm:$0xff] %v197_v27  ;;  %v419_v29 = vpop.f32.mrb[21].mxu0  ;;  %294 = vst [vmem:[#allocation7 + $0xb8] sm:$0xff] %v262_v28  ;;  %v458_v30 = vpop.f32.mrb[21].mxu1 }
 0x148   :  { %v202_v31 = vpop.f32.mrb[22].mxu0  ;;  %v267_v32 = vpop.f32.mrb[22].mxu1 }
 0x149   :  { %282 = vst [vmem:[#allocation7 + $0x58] sm:$0xff] %v202_v31  ;;  %v422_v33 = vpop.f32.mrb[23].mxu0  ;;  %295 = vst [vmem:[#allocation7 + $0xc0] sm:$0xff] %v267_v32  ;;  %v461_v34 = vpop.f32.mrb[23].mxu1 }
 0x14c   :  { %v207_v35 = vpop.f32.mrb[24].mxu0 }
 0x14d   :  { %283 = vst [vmem:[#allocation7 + $0x60] sm:$0xff] %v207_v35  ;;  %v425_v36 = vpop.f32.mrb[25].mxu0 }
 0x14e   :  { %565 = shalt.err (!%p562_p6)
}
 0x14f   :  { %s566_s10 = scalar_lea.hbm %s702_s2, 3200 }
 0x150   :  { %p567_p7 = scmp.ne.s32.totalorder %s702_s2, %s566_s10  ;;  %p570_p8 = scmp.lt.u32.totalorder %s566_s10, %s702_s2 }
 0x152   :  { %p572_p9 = pnand %p570_p8, %p567_p7 }
 0x154   :  { %575 = shalt.err (!%p572_p9)
}
 0x155   :  { %307 = dma.vmem_to_hbm [thread:$0]  %s302_s6, 3200, %s702_s2, [#allocation4], %s583_s19, %s583_s19, %s584_s20  }
 0x156   :  { %580 = dma.done.wait [#allocation4], 3200  }
 0x157   :  { %581 = vsyncadd [#allocation4], 4294964096 }
 0x158   :  { %311 = vsyncpa [#allocation3], 1 }
 0x159   :  { %312 = vsyncpa [#allocation6], 1 }
 0x15a   :  { %313 = vsyncpa [#allocation4], 1 }

</bundles_post_ra>
